<compile_context>
chip_gen: v7x
topology: tpu7x:2x2x1
jax: 0.10.0
libtpu: 0.0.40
codegen_flags: <defaults>
</compile_context>

<pallas_src>
import math

import jax
import jax.numpy as jnp
from jax.experimental import pallas as pl
from jax.experimental.pallas import tpu as pltpu

# Matmul input dtype.  jnp.float32 keeps exact 1e-4 parity with the f32
# reference; use jnp.bfloat16 on v6e/v7x (MXU is bf16-native) and loosen the
# test tolerance accordingly.  Accumulation stays f32 either way.
COMPUTE_DTYPE = jnp.float32


def encoder_layer_kernel(x_ref, wq_ref, wk_ref, wv_ref, bq_ref, bk_ref, bv_ref,
                         wo_ref, bo_ref, lnw_ref, lnb_ref, wf_ref, bf_ref,
                         out_ref):
    """One full encoder layer for ONE sequence (grid axis 0 = batch index).

    x_ref  : (1, L, D)  this sequence's tokens
    wq/wk/wv_ref : (H, D, dh) head-major in-projection weights
    bq/bk/bv_ref : (H, 1, dh) head-major in-projection biases
    wo_ref : (H, dh, D) head-major output-projection weight
    out_ref: (1, L, F)
    """
    _, L, D = x_ref.shape
    H, _, dh = wq_ref.shape
    scale = 1.0 / math.sqrt(dh)

    def mm(a, b, dn):
        # All MXU work funnels through here (f32 accumulation always).
        return jax.lax.dot_general(a.astype(COMPUTE_DTYPE),
                                   b.astype(COMPUTE_DTYPE),
                                   dn, preferred_element_type=jnp.float32)

    dn_bmm = (((2,), (1,)), ((0,), (0,)))   # (H,L,K) x (H,K,M) -> (H,L,M)
    dn_qkT = (((2,), (2,)), ((0,), (0,)))   # (H,L,d) x (H,L,d) -> (H,Lq,Lk)
    dn_2d = (((1,), (0,)), ((), ()))        # (L,K)   x (K,M)   -> (L,M)

    x = x_ref[0]                                        # (L, D)
    xb = jnp.broadcast_to(x[None, :, :], (H, L, D))     # head-batched view

    # --- head-batched QKV in-projection (contraction K = D, full depth) ---
    q = mm(xb, wq_ref[...], dn_bmm) + bq_ref[...]       # (H, L, dh)
    k = mm(xb, wk_ref[...], dn_bmm) + bk_ref[...]
    v = mm(xb, wv_ref[...], dn_bmm) + bv_ref[...]
    q = q * scale

    # --- per-sequence attention: no mask / bias needed at all ---
    s = mm(q, k, dn_qkT)                                # (H, L, L)
    s = s - jnp.max(s, axis=-1, keepdims=True)
    p = jnp.exp(s)                                      # EUP
    denom = jnp.sum(p, axis=-1, keepdims=True)

    o = mm(p, v, dn_bmm)                                # (H, L, dh)
    # Normalize the small (H, L, dh) output instead of the (H, L, L) probs.
    # approx=True moves this to the EUP slot once tolerance is validated.
    o = o * pl.reciprocal(denom, approx=False)

    # --- output projection: head-batched (H,L,dh)@(H,dh,D) then head-sum;
    #     algebraically identical to concat(heads) @ Wo (no concatenate). ---
    attn = mm(o, wo_ref[...], dn_bmm)                   # (H, L, D)
    attn = jnp.sum(attn, axis=0) + bo_ref[...]          # (L, D)

    # Dropout (inside MHA) is identity in eval mode.
    # --- LayerNorm over last dim (eps=1e-5, biased variance, as in torch) ---
    mu = jnp.mean(attn, axis=-1, keepdims=True)
    var = jnp.mean(jnp.square(attn - mu), axis=-1, keepdims=True)
    z = (attn - mu) * jax.lax.rsqrt(var + 1e-5)
    z = z * lnw_ref[...] + lnb_ref[...]

    # --- FFN linear (lane-dense F) ---
    out_ref[0] = mm(z, wf_ref[...], dn_2d) + bf_ref[...]


def custom_encoder_layer(src, params, nhead):
    """src: (L, N, D) float32 (seq, batch, d_model).  Returns (L, N, F)."""
    L, N, D = src.shape
    F = params["wf"].shape[1]
    assert D % nhead == 0, "d_model must be divisible by nhead"
    dh = D // nhead

    # Batch-major activations for the per-sequence grid (cheap XLA transpose).
    x_nld = jnp.transpose(src, (1, 0, 2))               # (N, L, D)

    # Split the fused in-projection into head-major layouts OUTSIDE the kernel
    # so no sub-tile lane slicing / relayout happens inside it.
    w_qkv, b_qkv = params["w_qkv"], params["b_qkv"]

    def w_heads(w2d):                                    # (D, D) -> (H, D, dh)
        return jnp.transpose(w2d.reshape(D, nhead, dh), (1, 0, 2))

    def b_heads(b1d):                                    # (D,)   -> (H, 1, dh)
        return b1d.reshape(nhead, 1, dh)

    wq = w_heads(w_qkv[:, 0 * D:1 * D])
    wk = w_heads(w_qkv[:, 1 * D:2 * D])
    wv = w_heads(w_qkv[:, 2 * D:3 * D])
    bq = b_heads(b_qkv[0, 0 * D:1 * D])
    bk = b_heads(b_qkv[0, 1 * D:2 * D])
    bv = b_heads(b_qkv[0, 2 * D:3 * D])
    wo_h = params["wo"].reshape(nhead, dh, D)            # rows h*dh:(h+1)*dh -> head h

    # Weights: constant index_map -> DMA'd once, VMEM-resident across steps.
    def resident(a):
        return pl.BlockSpec(a.shape, lambda n: (0,) * a.ndim)

    out_nlf = pl.pallas_call(
        encoder_layer_kernel,
        out_shape=jax.ShapeDtypeStruct((N, L, F), jnp.float32),
        grid=(N,),                                        # one sequence per step
        in_specs=[
            pl.BlockSpec((1, L, D), lambda n: (n, 0, 0)),     # activations tile
            resident(wq), resident(wk), resident(wv),
            resident(bq), resident(bk), resident(bv),
            resident(wo_h), resident(params["bo"]),
            resident(params["ln_w"]), resident(params["ln_b"]),
            resident(params["wf"]), resident(params["bf"]),
        ],
        out_specs=pl.BlockSpec((1, L, F), lambda n: (n, 0, 0)),
        compiler_params=pltpu.CompilerParams(
            dimension_semantics=("parallel",),            # megacore over batch
        ),
    )(x_nld, wq, wk, wv, bq, bk, bv, wo_h,
      params["bo"], params["ln_w"], params["ln_b"], params["wf"], params["bf"])

    return jnp.transpose(out_nlf, (1, 0, 2))              # back to (L, N, F)


def make_params(key, d_model, dim_feedforward):
    """Deterministic synthetic parameters.  Weights are stored in the
    x @ W convention; the QKV projection is stored fused (like
    nn.MultiheadAttention's in_proj_weight / in_proj_bias)."""
    ks = jax.random.split(key, 6)
    s = 0.1
    return {
        "w_qkv": s * jax.random.normal(ks[0], (d_model, 3 * d_model), jnp.float32),
        "b_qkv": s * jax.random.normal(ks[1], (1, 3 * d_model), jnp.float32),
        "wo":    s * jax.random.normal(ks[2], (d_model, d_model), jnp.float32),
        "bo":    s * jax.random.normal(ks[3], (1, d_model), jnp.float32),
        "ln_w":  jnp.ones((1, d_model), jnp.float32),
        "ln_b":  jnp.zeros((1, d_model), jnp.float32),
        "wf":    s * jax.random.normal(ks[4], (d_model, dim_feedforward), jnp.float32),
        "bf":    s * jax.random.normal(ks[5], (1, dim_feedforward), jnp.float32),
    }


def reference_forward(src, p, nhead):
    """Pure-JAX reference mirroring torch semantics of the module's forward."""
    L, N, D = src.shape
    dh = D // nhead
    qkv = jnp.einsum("lnd,de->lne", src, p["w_qkv"]) + p["b_qkv"]
    q, k, v = qkv[..., :D], qkv[..., D:2 * D], qkv[..., 2 * D:]
    qh = q.reshape(L, N, nhead, dh)
    kh = k.reshape(L, N, nhead, dh)
    vh = v.reshape(L, N, nhead, dh)
    s = jnp.einsum("qnhd,knhd->nhqk", qh, kh) / jnp.sqrt(jnp.float32(dh))
    a = jax.nn.softmax(s, axis=-1)
    o = jnp.einsum("nhqk,knhd->qnhd", a, vh).reshape(L, N, D)
    o = jnp.einsum("lnd,de->lne", o, p["wo"]) + p["bo"]
    mu = o.mean(-1, keepdims=True)
    var = ((o - mu) ** 2).mean(-1, keepdims=True)
    z = (o - mu) / jnp.sqrt(var + 1e-5) * p["ln_w"][0] + p["ln_b"][0]
    return jnp.einsum("lnd,df->lnf", z, p["wf"]) + p["bf"]


if __name__ == "__main__":
    d_model = 32
    nhead = 4
    dim_feedforward = 128   # multiple of 128 -> lane-dense output stores
    seq_len = 8
    batch = 2

    key = jax.random.PRNGKey(0)
    k_src, k_par = jax.random.split(key, 2)

    src = jax.random.normal(k_src, (seq_len, batch, d_model), jnp.float32)
    params = make_params(k_par, d_model, dim_feedforward)

    out = custom_encoder_layer(src, params, nhead)
    out = jax.block_until_ready(out)

    ref = reference_forward(src, params, nhead)
    assert out.shape == (seq_len, batch, dim_feedforward)
    assert jnp.allclose(out, ref, rtol=1e-4, atol=1e-4), \
        float(jnp.max(jnp.abs(out - ref)))

    print("KERNEL_OK")
</pallas_src>

<mosaic_0001>
module attributes {stable_mosaic.version = 11 : i64} {
  func.func @encoder_layer_kernel(%arg0: i32, %arg1: memref<1x8x32xf32, #tpu.memory_space<vmem>>, %arg2: memref<4x32x8xf32, #tpu.memory_space<vmem>>, %arg3: memref<4x32x8xf32, #tpu.memory_space<vmem>>, %arg4: memref<4x32x8xf32, #tpu.memory_space<vmem>>, %arg5: memref<4x1x8xf32, #tpu.memory_space<vmem>>, %arg6: memref<4x1x8xf32, #tpu.memory_space<vmem>>, %arg7: memref<4x1x8xf32, #tpu.memory_space<vmem>>, %arg8: memref<4x8x32xf32, #tpu.memory_space<vmem>>, %arg9: memref<1x32xf32, #tpu.memory_space<vmem>>, %arg10: memref<1x32xf32, #tpu.memory_space<vmem>>, %arg11: memref<1x32xf32, #tpu.memory_space<vmem>>, %arg12: memref<32x128xf32, #tpu.memory_space<vmem>>, %arg13: memref<1x128xf32, #tpu.memory_space<vmem>>, %arg14: memref<1x8x128xf32, #tpu.memory_space<vmem>>) attributes {dimension_semantics = [#tpu.dimension_semantics<parallel>], iteration_bounds = array<i64: 2>, scalar_prefetch = 0 : i64, scratch_operands = 0 : i64, tpu.core_type = #tpu.core_type<tc>, window_params = [{transform_indices = @transform_0, window_bounds = array<i64: 1, 8, 32>}, {pipeline_mode = #tpu.pipeline_mode<synchronous>, transform_indices = @transform_1, window_bounds = array<i64: 4, 32, 8>}, {pipeline_mode = #tpu.pipeline_mode<synchronous>, transform_indices = @transform_2, window_bounds = array<i64: 4, 32, 8>}, {pipeline_mode = #tpu.pipeline_mode<synchronous>, transform_indices = @transform_3, window_bounds = array<i64: 4, 32, 8>}, {pipeline_mode = #tpu.pipeline_mode<synchronous>, transform_indices = @transform_4, window_bounds = array<i64: 4, 1, 8>}, {pipeline_mode = #tpu.pipeline_mode<synchronous>, transform_indices = @transform_5, window_bounds = array<i64: 4, 1, 8>}, {pipeline_mode = #tpu.pipeline_mode<synchronous>, transform_indices = @transform_6, window_bounds = array<i64: 4, 1, 8>}, {pipeline_mode = #tpu.pipeline_mode<synchronous>, transform_indices = @transform_7, window_bounds = array<i64: 4, 8, 32>}, {pipeline_mode = #tpu.pipeline_mode<synchronous>, transform_indices = @transform_8, window_bounds = array<i64: 1, 32>}, {pipeline_mode = #tpu.pipeline_mode<synchronous>, transform_indices = @transform_9, window_bounds = array<i64: 1, 32>}, {pipeline_mode = #tpu.pipeline_mode<synchronous>, transform_indices = @transform_10, window_bounds = array<i64: 1, 32>}, {pipeline_mode = #tpu.pipeline_mode<synchronous>, transform_indices = @transform_11, window_bounds = array<i64: 32, 128>}, {pipeline_mode = #tpu.pipeline_mode<synchronous>, transform_indices = @transform_12, window_bounds = array<i64: 1, 128>}, {transform_indices = @transform_13, window_bounds = array<i64: 1, 8, 128>}]} {
    %c0 = arith.constant 0 : index
    %c0_0 = arith.constant 0 : index
    %c0_1 = arith.constant 0 : index
    %0 = vector.load %arg1[%c0, %c0_0, %c0_1] : memref<1x8x32xf32, #tpu.memory_space<vmem>>, vector<1x8x32xf32>
    %1 = vector.shape_cast %0 : vector<1x8x32xf32> to vector<8x32xf32>
    %2 = vector.shape_cast %1 : vector<8x32xf32> to vector<1x8x32xf32>
    %3 = vector.shape_cast %2 : vector<1x8x32xf32> to vector<1x8x32xf32>
    %4 = vector.broadcast %3 : vector<1x8x32xf32> to vector<4x8x32xf32>
    %c0_2 = arith.constant 0 : index
    %c0_3 = arith.constant 0 : index
    %c0_4 = arith.constant 0 : index
    %5 = vector.load %arg2[%c0_2, %c0_3, %c0_4] : memref<4x32x8xf32, #tpu.memory_space<vmem>>, vector<4x32x8xf32>
    %cst = arith.constant dense<0.000000e+00> : vector<4x8x8xf32>
    %6 = tpu.matmul %4, %5, %cst {dimension_numbers = #tpu.dot_dimension_numbers<[2], [1], [1], [2], [0, 0, 0, 1, 1, 2], [0], [0]>} : vector<4x8x32xf32>, vector<4x32x8xf32>, vector<4x8x8xf32> -> vector<4x8x8xf32>
    %c0_5 = arith.constant 0 : index
    %c0_6 = arith.constant 0 : index
    %c0_7 = arith.constant 0 : index
    %7 = vector.load %arg5[%c0_5, %c0_6, %c0_7] : memref<4x1x8xf32, #tpu.memory_space<vmem>>, vector<4x1x8xf32>
    %8 = vector.broadcast %7 : vector<4x1x8xf32> to vector<4x8x8xf32>
    %9 = arith.addf %6, %8 : vector<4x8x8xf32>
    %c0_8 = arith.constant 0 : index
    %c0_9 = arith.constant 0 : index
    %c0_10 = arith.constant 0 : index
    %10 = vector.load %arg3[%c0_8, %c0_9, %c0_10] : memref<4x32x8xf32, #tpu.memory_space<vmem>>, vector<4x32x8xf32>
    %cst_11 = arith.constant dense<0.000000e+00> : vector<4x8x8xf32>
    %11 = tpu.matmul %4, %10, %cst_11 {dimension_numbers = #tpu.dot_dimension_numbers<[2], [1], [1], [2], [0, 0, 0, 1, 1, 2], [0], [0]>} : vector<4x8x32xf32>, vector<4x32x8xf32>, vector<4x8x8xf32> -> vector<4x8x8xf32>
    %c0_12 = arith.constant 0 : index
    %c0_13 = arith.constant 0 : index
    %c0_14 = arith.constant 0 : index
    %12 = vector.load %arg6[%c0_12, %c0_13, %c0_14] : memref<4x1x8xf32, #tpu.memory_space<vmem>>, vector<4x1x8xf32>
    %13 = vector.broadcast %12 : vector<4x1x8xf32> to vector<4x8x8xf32>
    %14 = arith.addf %11, %13 : vector<4x8x8xf32>
    %c0_15 = arith.constant 0 : index
    %c0_16 = arith.constant 0 : index
    %c0_17 = arith.constant 0 : index
    %15 = vector.load %arg4[%c0_15, %c0_16, %c0_17] : memref<4x32x8xf32, #tpu.memory_space<vmem>>, vector<4x32x8xf32>
    %cst_18 = arith.constant dense<0.000000e+00> : vector<4x8x8xf32>
    %16 = tpu.matmul %4, %15, %cst_18 {dimension_numbers = #tpu.dot_dimension_numbers<[2], [1], [1], [2], [0, 0, 0, 1, 1, 2], [0], [0]>} : vector<4x8x32xf32>, vector<4x32x8xf32>, vector<4x8x8xf32> -> vector<4x8x8xf32>
    %c0_19 = arith.constant 0 : index
    %c0_20 = arith.constant 0 : index
    %c0_21 = arith.constant 0 : index
    %17 = vector.load %arg7[%c0_19, %c0_20, %c0_21] : memref<4x1x8xf32, #tpu.memory_space<vmem>>, vector<4x1x8xf32>
    %18 = vector.broadcast %17 : vector<4x1x8xf32> to vector<4x8x8xf32>
    %19 = arith.addf %16, %18 : vector<4x8x8xf32>
    %cst_22 = arith.constant 0.353553385 : f32
    %20 = vector.broadcast %cst_22 : f32 to vector<4x8x8xf32>
    %21 = arith.mulf %9, %20 : vector<4x8x8xf32>
    %cst_23 = arith.constant dense<0.000000e+00> : vector<4x8x8xf32>
    %22 = tpu.matmul %21, %14, %cst_23 {dimension_numbers = #tpu.dot_dimension_numbers<[2], [2], [1], [1], [0, 0, 0, 1, 1, 1], [0], [0]>} : vector<4x8x8xf32>, vector<4x8x8xf32>, vector<4x8x8xf32> -> vector<4x8x8xf32>
    %cst_24 = arith.constant dense<0xFF800000> : vector<4x8xf32>
    %23 = vector.multi_reduction <maximumf>, %22, %cst_24 [2] : vector<4x8x8xf32> to vector<4x8xf32>
    %24 = vector.shape_cast %23 : vector<4x8xf32> to vector<4x8x1xf32>
    %25 = vector.broadcast %24 : vector<4x8x1xf32> to vector<4x8x8xf32>
    %26 = arith.subf %22, %25 : vector<4x8x8xf32>
    %27 = math.exp %26 : vector<4x8x8xf32>
    %cst_25 = arith.constant dense<0.000000e+00> : vector<4x8xf32>
    %28 = vector.multi_reduction <add>, %27, %cst_25 [2] : vector<4x8x8xf32> to vector<4x8xf32>
    %29 = vector.shape_cast %28 : vector<4x8xf32> to vector<4x8x1xf32>
    %cst_26 = arith.constant dense<0.000000e+00> : vector<4x8x8xf32>
    %30 = tpu.matmul %27, %19, %cst_26 {dimension_numbers = #tpu.dot_dimension_numbers<[2], [1], [1], [2], [0, 0, 0, 1, 1, 2], [0], [0]>} : vector<4x8x8xf32>, vector<4x8x8xf32>, vector<4x8x8xf32> -> vector<4x8x8xf32>
    %31 = tpu.reciprocal %29 : vector<4x8x1xf32> -> vector<4x8x1xf32>
    %32 = vector.broadcast %31 : vector<4x8x1xf32> to vector<4x8x8xf32>
    %33 = arith.mulf %30, %32 : vector<4x8x8xf32>
    %c0_27 = arith.constant 0 : index
    %c0_28 = arith.constant 0 : index
    %c0_29 = arith.constant 0 : index
    %34 = vector.load %arg8[%c0_27, %c0_28, %c0_29] : memref<4x8x32xf32, #tpu.memory_space<vmem>>, vector<4x8x32xf32>
    %cst_30 = arith.constant dense<0.000000e+00> : vector<4x8x32xf32>
    %35 = tpu.matmul %33, %34, %cst_30 {dimension_numbers = #tpu.dot_dimension_numbers<[2], [1], [1], [2], [0, 0, 0, 1, 1, 2], [0], [0]>} : vector<4x8x8xf32>, vector<4x8x32xf32>, vector<4x8x32xf32> -> vector<4x8x32xf32>
    %cst_31 = arith.constant dense<0.000000e+00> : vector<8x32xf32>
    %36 = vector.multi_reduction <add>, %35, %cst_31 [0] : vector<4x8x32xf32> to vector<8x32xf32>
    %c0_32 = arith.constant 0 : index
    %c0_33 = arith.constant 0 : index
    %37 = vector.load %arg9[%c0_32, %c0_33] : memref<1x32xf32, #tpu.memory_space<vmem>>, vector<1x32xf32>
    %38 = vector.broadcast %37 : vector<1x32xf32> to vector<8x32xf32>
    %39 = arith.addf %36, %38 : vector<8x32xf32>
    %cst_34 = arith.constant dense<0.000000e+00> : vector<8xf32>
    %40 = vector.multi_reduction <add>, %39, %cst_34 [1] : vector<8x32xf32> to vector<8xf32>
    %41 = vector.shape_cast %40 : vector<8xf32> to vector<8x1xf32>
    %cst_35 = arith.constant 3.200000e+01 : f32
    %42 = vector.broadcast %cst_35 : f32 to vector<8x1xf32>
    %43 = arith.divf %41, %42 : vector<8x1xf32>
    %44 = vector.broadcast %43 : vector<8x1xf32> to vector<8x32xf32>
    %45 = arith.subf %39, %44 : vector<8x32xf32>
    %46 = arith.mulf %45, %45 : vector<8x32xf32>
    %cst_36 = arith.constant dense<0.000000e+00> : vector<8xf32>
    %47 = vector.multi_reduction <add>, %46, %cst_36 [1] : vector<8x32xf32> to vector<8xf32>
    %48 = vector.shape_cast %47 : vector<8xf32> to vector<8x1xf32>
    %cst_37 = arith.constant 3.200000e+01 : f32
    %49 = vector.broadcast %cst_37 : f32 to vector<8x1xf32>
    %50 = arith.divf %48, %49 : vector<8x1xf32>
    %51 = vector.broadcast %43 : vector<8x1xf32> to vector<8x32xf32>
    %52 = arith.subf %39, %51 : vector<8x32xf32>
    %cst_38 = arith.constant 9.99999974E-6 : f32
    %53 = vector.broadcast %cst_38 : f32 to vector<8x1xf32>
    %54 = arith.addf %50, %53 : vector<8x1xf32>
    %55 = math.rsqrt %54 : vector<8x1xf32>
    %56 = vector.broadcast %55 : vector<8x1xf32> to vector<8x32xf32>
    %57 = arith.mulf %52, %56 : vector<8x32xf32>
    %c0_39 = arith.constant 0 : index
    %c0_40 = arith.constant 0 : index
    %58 = vector.load %arg10[%c0_39, %c0_40] : memref<1x32xf32, #tpu.memory_space<vmem>>, vector<1x32xf32>
    %59 = vector.broadcast %58 : vector<1x32xf32> to vector<8x32xf32>
    %60 = arith.mulf %57, %59 : vector<8x32xf32>
    %c0_41 = arith.constant 0 : index
    %c0_42 = arith.constant 0 : index
    %61 = vector.load %arg11[%c0_41, %c0_42] : memref<1x32xf32, #tpu.memory_space<vmem>>, vector<1x32xf32>
    %62 = vector.broadcast %61 : vector<1x32xf32> to vector<8x32xf32>
    %63 = arith.addf %60, %62 : vector<8x32xf32>
    %c0_43 = arith.constant 0 : index
    %c0_44 = arith.constant 0 : index
    %64 = vector.load %arg12[%c0_43, %c0_44] : memref<32x128xf32, #tpu.memory_space<vmem>>, vector<32x128xf32>
    %cst_45 = arith.constant dense<0.000000e+00> : vector<8x128xf32>
    %65 = tpu.matmul %63, %64, %cst_45 {dimension_numbers = #tpu.dot_dimension_numbers<[1], [0], [0], [1], [0, 0, 1, 1], [], []>} : vector<8x32xf32>, vector<32x128xf32>, vector<8x128xf32> -> vector<8x128xf32>
    %c0_46 = arith.constant 0 : index
    %c0_47 = arith.constant 0 : index
    %66 = vector.load %arg13[%c0_46, %c0_47] : memref<1x128xf32, #tpu.memory_space<vmem>>, vector<1x128xf32>
    %67 = vector.broadcast %66 : vector<1x128xf32> to vector<8x128xf32>
    %68 = arith.addf %65, %67 : vector<8x128xf32>
    %c0_48 = arith.constant 0 : index
    %c0_49 = arith.constant 0 : index
    %c0_50 = arith.constant 0 : index
    %69 = vector.load %arg14[%c0_48, %c0_49, %c0_50] : memref<1x8x128xf32, #tpu.memory_space<vmem>>, vector<1x8x128xf32>
    %70 = vector.shape_cast %69 : vector<1x8x128xf32> to vector<8x128xf32>
    %71 = vector.shape_cast %68 : vector<8x128xf32> to vector<1x8x128xf32>
    tpu.vector_store %arg14[%c0_48, %c0_49, %c0_50], %71 {strides = array<i32>} : memref<1x8x128xf32, #tpu.memory_space<vmem>>, vector<1x8x128xf32>,
    return
  }
  func.func @transform_0(%arg0: i32) -> (i32, i32, i32) {
    %c0_i32 = arith.constant 0 : i32
    %c0_i32_0 = arith.constant 0 : i32
    %c0_i32_1 = arith.constant 0 : i32
    return %arg0, %c0_i32, %c0_i32_0 : i32, i32, i32
  }
  func.func @transform_1(%arg0: i32) -> (i32, i32, i32) {
    %c0_i32 = arith.constant 0 : i32
    %c0_i32_0 = arith.constant 0 : i32
    %c0_i32_1 = arith.constant 0 : i32
    %c0_i32_2 = arith.constant 0 : i32
    return %c0_i32, %c0_i32_0, %c0_i32_1 : i32, i32, i32
  }
  func.func @transform_2(%arg0: i32) -> (i32, i32, i32) {
    %c0_i32 = arith.constant 0 : i32
    %c0_i32_0 = arith.constant 0 : i32
    %c0_i32_1 = arith.constant 0 : i32
    %c0_i32_2 = arith.constant 0 : i32
    return %c0_i32, %c0_i32_0, %c0_i32_1 : i32, i32, i32
  }
  func.func @transform_3(%arg0: i32) -> (i32, i32, i32) {
    %c0_i32 = arith.constant 0 : i32
    %c0_i32_0 = arith.constant 0 : i32
    %c0_i32_1 = arith.constant 0 : i32
    %c0_i32_2 = arith.constant 0 : i32
    return %c0_i32, %c0_i32_0, %c0_i32_1 : i32, i32, i32
  }
  func.func @transform_4(%arg0: i32) -> (i32, i32, i32) {
    %c0_i32 = arith.constant 0 : i32
    %c0_i32_0 = arith.constant 0 : i32
    %c0_i32_1 = arith.constant 0 : i32
    %c0_i32_2 = arith.constant 0 : i32
    return %c0_i32, %c0_i32_0, %c0_i32_1 : i32, i32, i32
  }
  func.func @transform_5(%arg0: i32) -> (i32, i32, i32) {
    %c0_i32 = arith.constant 0 : i32
    %c0_i32_0 = arith.constant 0 : i32
    %c0_i32_1 = arith.constant 0 : i32
    %c0_i32_2 = arith.constant 0 : i32
    return %c0_i32, %c0_i32_0, %c0_i32_1 : i32, i32, i32
  }
  func.func @transform_6(%arg0: i32) -> (i32, i32, i32) {
    %c0_i32 = arith.constant 0 : i32
    %c0_i32_0 = arith.constant 0 : i32
    %c0_i32_1 = arith.constant 0 : i32
    %c0_i32_2 = arith.constant 0 : i32
    return %c0_i32, %c0_i32_0, %c0_i32_1 : i32, i32, i32
  }
  func.func @transform_7(%arg0: i32) -> (i32, i32, i32) {
    %c0_i32 = arith.constant 0 : i32
    %c0_i32_0 = arith.constant 0 : i32
    %c0_i32_1 = arith.constant 0 : i32
    %c0_i32_2 = arith.constant 0 : i32
    return %c0_i32, %c0_i32_0, %c0_i32_1 : i32, i32, i32
  }
  func.func @transform_8(%arg0: i32) -> (i32, i32) {
    %c0_i32 = arith.constant 0 : i32
    %c0_i32_0 = arith.constant 0 : i32
    %c0_i32_1 = arith.constant 0 : i32
    return %c0_i32, %c0_i32_0 : i32, i32
  }
  func.func @transform_9(%arg0: i32) -> (i32, i32) {
    %c0_i32 = arith.constant 0 : i32
    %c0_i32_0 = arith.constant 0 : i32
    %c0_i32_1 = arith.constant 0 : i32
    return %c0_i32, %c0_i32_0 : i32, i32
  }
  func.func @transform_10(%arg0: i32) -> (i32, i32) {
    %c0_i32 = arith.constant 0 : i32
    %c0_i32_0 = arith.constant 0 : i32
    %c0_i32_1 = arith.constant 0 : i32
    return %c0_i32, %c0_i32_0 : i32, i32
  }
  func.func @transform_11(%arg0: i32) -> (i32, i32) {
    %c0_i32 = arith.constant 0 : i32
    %c0_i32_0 = arith.constant 0 : i32
    %c0_i32_1 = arith.constant 0 : i32
    return %c0_i32, %c0_i32_0 : i32, i32
  }
  func.func @transform_12(%arg0: i32) -> (i32, i32) {
    %c0_i32 = arith.constant 0 : i32
    %c0_i32_0 = arith.constant 0 : i32
    %c0_i32_1 = arith.constant 0 : i32
    return %c0_i32, %c0_i32_0 : i32, i32
  }
  func.func @transform_13(%arg0: i32) -> (i32, i32, i32) {
    %c0_i32 = arith.constant 0 : i32
    %c0_i32_0 = arith.constant 0 : i32
    %c0_i32_1 = arith.constant 0 : i32
    return %arg0, %c0_i32, %c0_i32_0 : i32, i32, i32
  }
}

</mosaic_0001>

<bundles_post_ra>
// kernel: tpu_custom_call.1
= control target key start
LH: loop header
LB: loop body
LE: loop exit
PB: predicated region body
PF: predicated region fallthrough
CT: control target
= control target key end

     0   :  { %18 = vsyncpa [#allocation3], 0  ;;  %s3641_s0 = inlined_call_operand.vmem [shape: f32[2,8,32], index: 0, kind: input, shape index: {}]   ;;  %s3642_s1 = inlined_call_operand.vmem [shape: f32[4,32,8], index: 1, kind: input, shape index: {}]   ;;  %s3643_s2 = inlined_call_operand.vmem [shape: f32[4,32,8], index: 2, kind: input, shape index: {}]   ;;  %s3644_s3 = inlined_call_operand.vmem [shape: f32[4,32,8], index: 3, kind: input, shape index: {}]   ;;  %s3645_s4 = inlined_call_operand.vmem [shape: f32[4,1,8], index: 4, kind: input, shape index: {}]   ;;  %s3646_s5 = inlined_call_operand.vmem [shape: f32[4,1,8], index: 5, kind: input, shape index: {}]   ;;  %s3647_s6 = inlined_call_operand.vmem [shape: f32[4,1,8], index: 6, kind: input, shape index: {}]   ;;  %s3648_s7 = inlined_call_operand.vmem [shape: f32[4,8,32], index: 7, kind: input, shape index: {}]   ;;  %s3649_s8 = inlined_call_operand.vmem [shape: f32[1,32], index: 8, kind: input, shape index: {}]   ;;  %s3650_s9 = inlined_call_operand.vmem [shape: f32[1,32], index: 9, kind: input, shape index: {}]   ;;  %s3651_s10 = inlined_call_operand.vmem [shape: f32[1,32], index: 10, kind: input, shape index: {}]   ;;  %s3652_s11 = inlined_call_operand.vmem [shape: f32[32,128], index: 11, kind: input, shape index: {}]   ;;  %s3653_s12 = inlined_call_operand.vmem [shape: f32[1,128], index: 12, kind: input, shape index: {}]   ;;  %s3654_s13 = inlined_call_operand.hbm [shape: f32[2,8,128], index: 13, kind: output, shape index: {}]  }
   0x1   :  { %20 = vsyncpa [#allocation3 + $0x1], 0  ;;  %s3180_s25 = smov 0   ;;  %s3182_s26 = smov 0  }
   0x2   :  { %s3184_s27 = smov 0   ;;  %s3186_s28 = smov 0  }
   0x3 LB: > { %3659 = sst [smem:[#allocation5_spill]] %s3100_s27  ;;  %s3201_s29 = sadd.s32 4294967295, %s3104_s28   ;;  %s3104_s28 = sphi %s3186_s28, %s3666_s28   ;;  %s3100_s27 = sphi %s3184_s27, %s3668_s27   ;;  %s3096_s26 = sphi %s3182_s26, %s3670_s26   ;;  %s3092_s25 = sphi %s3180_s25, %s3669_s25  }
   0x4   : > { %s2557_s30 = sadd.s32 4294967294, %s3104_s28   ;;  %s3205_s14 = sadd.s32 1, %s3104_s28  }
   0x5   : > { %3660 = sst [smem:[#allocation6_spill]] %s3205_s14  ;;  %s311_s15 = sadd.s32 1, %s3100_s27 }
   0x6   : > { %s308_s16 = ssub.s32 %s3104_s28, %s3205_s14  ;;  %p321_p0 = scmp.ne.s32.totalorder %s3100_s27, %s3096_s26 }
   0x7   : > { %p309_p1 = scmp.eq.s32.totalorder %s308_s16, 0  ;;  %p322_p2 = scmp.eq.s32.totalorder %s3201_s29, 1 }
   0x8   : > { %p327_p3 = scmp.ne.s32.totalorder %s3096_s26, %s3092_s25  ;;  %p328_p4 = scmp.eq.s32.totalorder %s2557_s30, 1 }
   0x9   : > { %s3216_s17 = scalar_select %p309_p1, %s3100_s27, %s311_s15  }
   0xa   : > { %p3218_p5 = por %p322_p2, %p321_p0  ;;  %p3222_p6 = por %p328_p4, %p327_p3 }
   0xb   : > { %3661 = sst [smem:[#allocation7_spill]] %s3216_s17  ;;  %p2560_p7 = scmp.ge.s32.totalorder %s3104_s28, 1 }
   0xc   : > { %s3663_s19 = scalar_select %p3222_p6, 1, 0 }
   0xd   : > { %p389_p8 = scmp.lt.s32.totalorder %s3104_s28, 3 }
   0xe   : > { %3664 = sst [smem:[#allocation8_spill]] %s3663_s19 }
   0xf   : > { %p390_p9 = pnand %p2560_p7, %p389_p8 }
  0x10   : > { %v437_v0 = vld [vmem:[%s3642_s1] sm:$0xff] (!%p390_p9)  ;;  %v438_v1 = vld [vmem:[%s3642_s1 + $0x8] sm:$0xff] (!%p390_p9)  ;;  %v3106_v3 = vmov (!%p390_p9), 0.0|0.0   ;;  %v439_v6 = vld [vmem:[%s3642_s1 + $0x10] sm:$0xff] (!%p390_p9)  ;;  %p432_p10 = scmp.lt.s32.totalorder (!%p390_p9), %s3201_s29, 1  ;;  %vm3107_vm0 = vmmov (!%p390_p9), 0  }
  0x11   : > { %393 = sbr.rel (%p390_p9) target bundleno = 1616 (0x650), region = 72  ;;  %v441_v2 = vld [vmem:[%s3642_s1 + $0x20] sm:$0xff] (!%p390_p9)  ;;  %2904 = vmatprep.subr.bf16.mxu0 (!%p390_p9), %v3106_v3  ;;  %2910 = vmatprep.subr.bf16.mxu1 (!%p390_p9), %v3106_v3  ;;  %v2905_v4 = vpack.c.bf16 (!%p390_p9), %v438_v1, %v437_v0  ;;  %v442_v5 = vld [vmem:[%s3642_s1 + $0x28] sm:$0xff] (!%p390_p9)  ;;  %v440_v7 = vld [vmem:[%s3642_s1 + $0x18] sm:$0xff] (!%p390_p9)  ;;  %v3108_v11 = vmov (!%p390_p9), 0.0   ;;  %vm481_vm1 = vcmask (!%p390_p9), 261120  }
  0x12   : > { %v2911_v8 = vpack.c.bf16 (!%p390_p9), %v442_v5, %v441_v2  ;;  %v443_v9 = vld [vmem:[%s3642_s1 + $0x30] sm:$0xff] (!%p390_p9)  ;;  %v444_v10 = vld [vmem:[%s3642_s1 + $0x38] sm:$0xff] (!%p390_p9)  ;;  %2709 = vmatprep.mubr.msk.f32.mxu0 (!%p390_p9), %vm3107_vm0, %v3108_v11  ;;  %2720 = vmatprep.mubr.msk.f32.mxu1 (!%p390_p9), %vm3107_vm0, %v3108_v11  ;;  %v2908_v12 = vpack.c.bf16 (!%p390_p9), %v440_v7, %v439_v6  ;;  %v445_v14 = vld [vmem:[%s3642_s1 + $0x40] sm:$0xff] (!%p390_p9)  ;;  %vm1417_vm2 = vcmask (!%p390_p9), 64512   ;;  %s429_s30 = sand.u32 (!%p390_p9), 1, %s3096_s26   ;;  %s2609_s27 = sshll.u32 (!%p390_p9), %s3201_s29, 7 }
  0x13   : > { %2906 = vmatpush3.bf16.msra.mxu0 (!%p390_p9), %v2905_v4  ;;  %v2914_v13 = vpack.c.bf16 (!%p390_p9), %v444_v10, %v443_v9  ;;  %v446_v15 = vld [vmem:[%s3642_s1 + $0x48] sm:$0xff] (!%p390_p9)  ;;  %v449_v16 = vld [vmem:[%s3642_s1 + $0x60] sm:$0xff] (!%p390_p9)  ;;  %v447_v21 = vld [vmem:[%s3642_s1 + $0x50] sm:$0xff] (!%p390_p9)  ;;  %s3599_s22 = scalar_lea.hbm (!%p390_p9), %s3654_s13, %s2609_s27  ;;  %s2485_s23 = scalar_lea.sflag (!%p390_p9), [#allocation3], %s429_s30 }
  0x14   : > { %2912 = vmatpush3.bf16.msra.mxu1 (!%p390_p9), %v2911_v8  ;;  %2907 = vmatprep.subr.bf16.mxu0 (!%p390_p9), %v3106_v3  ;;  %v450_v17 = vld [vmem:[%s3642_s1 + $0x68] sm:$0xff] (!%p390_p9)  ;;  %v2917_v19 = vpack.c.bf16 (!%p390_p9), %v446_v15, %v445_v14  ;;  %v448_v22 = vld [vmem:[%s3642_s1 + $0x58] sm:$0xff] (!%p390_p9)  ;;  %v451_v23 = vld [vmem:[%s3642_s1 + $0x70] sm:$0xff] (!%p390_p9) }
  0x15   : > { %2913 = vmatprep.subr.bf16.mxu1 (!%p390_p9), %v3106_v3  ;;  %v2923_v20 = vpack.c.bf16 (!%p390_p9), %v450_v17, %v449_v16  ;;  %v452_v24 = vld [vmem:[%s3642_s1 + $0x78] sm:$0xff] (!%p390_p9)  ;;  %v2920_v25 = vpack.c.bf16 (!%p390_p9), %v448_v22, %v447_v21  ;;  %v765_v27 = vld [vmem:[%s3643_s2] sm:$0xff] (!%p390_p9)  ;;  %v766_v28 = vld [vmem:[%s3643_s2 + $0x8] sm:$0xff] (!%p390_p9) }
  0x16   : > { %v2926_v26 = vpack.c.bf16 (!%p390_p9), %v452_v24, %v451_v23  ;;  %v769_v29 = vld [vmem:[%s3643_s2 + $0x20] sm:$0xff] (!%p390_p9)  ;;  %v770_v30 = vld [vmem:[%s3643_s2 + $0x28] sm:$0xff] (!%p390_p9)  ;;  %v2929_v31 = vpack.c.bf16 (!%p390_p9), %v766_v28, %v765_v27  ;;  %v767_v33 = vld [vmem:[%s3643_s2 + $0x10] sm:$0xff] (!%p390_p9) }
  0x17   : > { %2909 = vmatpush3.bf16.msra.mxu0 (!%p390_p9), %v2908_v12  ;;  %v2935_v32 = vpack.c.bf16 (!%p390_p9), %v770_v30, %v769_v29  ;;  %v768_v34 = vld [vmem:[%s3643_s2 + $0x18] sm:$0xff] (!%p390_p9)  ;;  %v771_v35 = vld [vmem:[%s3643_s2 + $0x30] sm:$0xff] (!%p390_p9)  ;;  %v773_v39 = vld [vmem:[%s3643_s2 + $0x40] sm:$0xff] (!%p390_p9) }
  0x18   : > { %s433_s15 = scalar_select %p432_p10, %s3201_s29, 1  ;;  %2915 = vmatpush3.bf16.msra.mxu1 %v2914_v13  ;;  %2916 = vmatprep.subr.bf16.mxu0 %v3106_v3  ;;  %v772_v36 = vld [vmem:[%s3643_s2 + $0x38] sm:$0xff]  ;;  %v2932_v37 = vpack.c.bf16 %v768_v34, %v767_v33  ;;  %v774_v40 = vld [vmem:[%s3643_s2 + $0x48] sm:$0xff]  ;;  %v777_v41 = vld [vmem:[%s3643_s2 + $0x60] sm:$0xff] }
  0x19   : > { %2922 = vmatprep.subr.bf16.mxu1 %v3106_v3  ;;  %v2938_v38 = vpack.c.bf16 %v772_v36, %v771_v35  ;;  %v778_v42 = vld [vmem:[%s3643_s2 + $0x68] sm:$0xff]  ;;  %v2941_v43 = vpack.c.bf16 %v774_v40, %v773_v39  ;;  %v775_v45 = vld [vmem:[%s3643_s2 + $0x50] sm:$0xff]  ;;  %v776_v46 = vld [vmem:[%s3643_s2 + $0x58] sm:$0xff]  ;;  %s3109_s29 = smov [#allocation2]  }
  0x1a   : > { %s2562_s21 = sshll.u32 %s433_s15, 3  ;;  %v2947_v44 = vpack.c.bf16 %v778_v42, %v777_v41  ;;  %v779_v47 = vld [vmem:[%s3643_s2 + $0x70] sm:$0xff]  ;;  %v780_v48 = vld [vmem:[%s3643_s2 + $0x78] sm:$0xff]  ;;  %v2944_v49 = vpack.c.bf16 %v776_v46, %v775_v45  ;;  %v1093_v51 = vld [vmem:[%s3644_s3 + $0x20] sm:$0xff] }
  0x1b   : > { %s435_s16 = scalar_lea.vmem %s3641_s0, %s2562_s21  ;;  %v2950_v50 = vpack.c.bf16 %v780_v48, %v779_v47  ;;  %v1094_v52 = vld [vmem:[%s3644_s3 + $0x28] sm:$0xff]  ;;  %v1095_v54 = vld [vmem:[%s3644_s3 + $0x30] sm:$0xff]  ;;  %v1096_v55 = vld [vmem:[%s3644_s3 + $0x38] sm:$0xff] }
  0x1c   : > { %v3277_v18 = vld [vmem:[%s435_s16] sm:$0xff]  ;;  %v2959_v53 = vpack.c.bf16 %v1094_v52, %v1093_v51  ;;  %v2962_v56 = vpack.c.bf16 %v1096_v55, %v1095_v54  ;;  %v1090_v58 = vld [vmem:[%s3644_s3 + $0x8] sm:$0xff]  ;;  %v1091_v63 = vld [vmem:[%s3644_s3 + $0x10] sm:$0xff]  ;;  %s2561_s16 = sshll.u32 %s429_s30, 3 }
  0x1d   : > { %2710 = vmatmul.mubr.msk.f32.vlgmr.msra.gmra.mrb[0].mxu0 %vm481_vm1, %v3277_v18  ;;  %2721 = vmatmul.mubr.msk.f32.vlgmr.msra.gmra.mrb[0].mxu1 %vm481_vm1, %v3277_v18  ;;  %v1089_v57 = vld [vmem:[%s3644_s3] sm:$0xff]  ;;  %v1102_v61 = vld [vmem:[%s3644_s3 + $0x68] sm:$0xff]  ;;  %v1092_v0 = vld [vmem:[%s3644_s3 + $0x18] sm:$0xff]  ;;  %s431_s17 = scalar_lea.vmem [#allocation2], %s2561_s16  ;;  %s3046_s16 = sshll.u32 %s3109_s29, 4  ;;  %s3047_s16 = int_to_ptr.vmem [resolvable:$false] %s3046_s16 }
  0x1e   : > { %2918 = vmatpush3.bf16.msra.mxu0 %v2917_v19  ;;  %2924 = vmatpush3.bf16.msra.mxu1 %v2923_v20  ;;  %v1101_v59 = vld [vmem:[%s3644_s3 + $0x60] sm:$0xff]  ;;  %v2953_v60 = vpack.c.bf16 %v1090_v58, %v1089_v57  ;;  %v1103_v1 = vld [vmem:[%s3644_s3 + $0x70] sm:$0xff]  ;;  %v2956_v2 = vpack.c.bf16 %v1092_v0, %v1091_v63  ;;  %v1104_v4 = vld [vmem:[%s3644_s3 + $0x78] sm:$0xff]  ;;  %s2498_s14 = sshll.u32 %s431_s17, 4  ;;  %s3048_s15 = scalar_lea.vmem %s3047_s16, 256  ;;  %s3601_s14 = int_to_ptr.vmem [resolvable:$true] %s2498_s14 }
  0x1f   : > { %2919 = vmatprep.subr.bf16.mxu0 %v3106_v3  ;;  %2925 = vmatprep.subr.bf16.mxu1 %v3106_v3  ;;  %v2971_v62 = vpack.c.bf16 %v1102_v61, %v1101_v59  ;;  %v2974_v5 = vpack.c.bf16 %v1104_v4, %v1103_v1  ;;  %v1097_v6 = vld [vmem:[%s3644_s3 + $0x40] sm:$0xff]  ;;  %v1098_v7 = vld [vmem:[%s3644_s3 + $0x48] sm:$0xff]  ;;  %v1099_v9 = vld [vmem:[%s3644_s3 + $0x50] sm:$0xff]  ;;  %s3042_s24 = scalar_lea.vmem %s3601_s14, 128  ;;  %p3049_p0 = scmp.lt.s32.totalorder %s3601_s14, %s3047_s16 }
  0x20   : > { %2731 = vmatprep.mubr.msk.f32.mxu0 %vm3107_vm0, %v3108_v11  ;;  %2742 = vmatprep.mubr.msk.f32.mxu1 %vm3107_vm0, %v3108_v11  ;;  %v2965_v8 = vpack.c.bf16 %v1098_v7, %v1097_v6  ;;  %v1100_v10 = vld [vmem:[%s3644_s3 + $0x58] sm:$0xff]  ;;  %v2563_v22 = vld [vmem:[%s3645_s4] ss:$0 sm:$0xff]  ;;  %v2565_v34 = vld [vmem:[%s3645_s4 + $0x2] ss:$0 sm:$0xff]  ;;  %p3043_p11 = scmp.ne.s32.totalorder %s3601_s14, %s3042_s24  ;;  %p3050_p1 = scmp.lt.s32.totalorder %s3048_s15, %s3042_s24 }
  0x21   : > { %v2968_v12 = vpack.c.bf16 %v1100_v10, %v1099_v9  ;;  %v2571_v23 = vld [vmem:[%s3646_s5] ss:$0 sm:$0xff]  ;;  %v2566_v35 = vld [vmem:[%s3645_s4 + $0x3] ss:$0 sm:$0xff]  ;;  %v2573_v36 = vld [vmem:[%s3646_s5 + $0x2] ss:$0 sm:$0xff] }
  0x22   : > { %2921 = vmatpush3.bf16.msra.mxu0 %v2920_v25  ;;  %2927 = vmatpush3.bf16.msra.mxu1 %v2926_v26  ;;  %v2572_v25 = vld [vmem:[%s3646_s5 + $0x1] ss:$0 sm:$0xff]  ;;  %p3044_p12 = pnand %p3043_p11, %p3218_p5  ;;  %p3051_p2 = por %p3050_p1, %p3049_p0 }
  0x23   : > { %2928 = vmatprep.subr.bf16.mxu0 %v3106_v3  ;;  %2934 = vmatprep.subr.bf16.mxu1 %v3106_v3  ;;  %v2564_v26 = vld [vmem:[%s3645_s4 + $0x1] ss:$0 sm:$0xff] }
  0x24   : > { %p3045_p13 = pneg %p3044_p12 }
  0x25   : > { %2732 = vmatmul.mubr.msk.f32.vlgmr.msra.gmra.mrb[2].mxu0 %vm481_vm1, %v3277_v18  ;;  %2743 = vmatmul.mubr.msk.f32.vlgmr.msra.gmra.mrb[2].mxu1 %vm481_vm1, %v3277_v18 }
  0x26   : > { %2930 = vmatpush3.bf16.msra.mxu0 %v2929_v31  ;;  %2936 = vmatpush3.bf16.msra.mxu1 %v2935_v32  ;;  %p3052_p3 = pnand %p3051_p2, %p3045_p13 }
  0x27   : > { %2931 = vmatprep.subr.bf16.mxu0 %v3106_v3  ;;  %2937 = vmatprep.subr.bf16.mxu1 %v3106_v3 }
  0x28   : > { %2753 = vmatprep.mubr.msk.f32.mxu0 %vm3107_vm0, %v3108_v11  ;;  %2764 = vmatprep.mubr.msk.f32.mxu1 %vm3107_vm0, %v3108_v11 }
  0x2a   : > { %2933 = vmatpush3.bf16.msra.mxu0 %v2932_v37  ;;  %2939 = vmatpush3.bf16.msra.mxu1 %v2938_v38  ;;  %v2574_v37 = vld [vmem:[%s3646_s5 + $0x3] ss:$0 sm:$0xff] }
  0x2b   : > { %2940 = vmatprep.subr.bf16.mxu0 %v3106_v3  ;;  %2946 = vmatprep.subr.bf16.mxu1 %v3106_v3 }
  0x2d   : > { %2754 = vmatmul.mubr.msk.f32.vlgmr.msra.gmra.mrb[4].mxu0 %vm481_vm1, %v3277_v18  ;;  %2765 = vmatmul.mubr.msk.f32.vlgmr.msra.gmra.mrb[4].mxu1 %vm481_vm1, %v3277_v18 }
  0x2e   : > { %2942 = vmatpush3.bf16.msra.mxu0 %v2941_v43  ;;  %2948 = vmatpush3.bf16.msra.mxu1 %v2947_v44 }
  0x2f   : > { %2943 = vmatprep.subr.bf16.mxu0 %v3106_v3  ;;  %2949 = vmatprep.subr.bf16.mxu1 %v3106_v3 }
  0x30   : > { %2775 = vmatprep.mubr.msk.f32.mxu0 %vm3107_vm0, %v3108_v11  ;;  %2786 = vmatprep.mubr.msk.f32.mxu1 %vm3107_vm0, %v3108_v11 }
  0x32   : > { %2945 = vmatpush3.bf16.msra.mxu0 %v2944_v49  ;;  %2951 = vmatpush3.bf16.msra.mxu1 %v2950_v50  ;;  %v2580_v49 = vld [vmem:[%s3647_s6 + $0x1] ss:$0 sm:$0xff] }
  0x33   : > { %2952 = vmatprep.subr.bf16.mxu0 %v3106_v3  ;;  %2958 = vmatprep.subr.bf16.mxu1 %v3106_v3 }
  0x35   : > { %2776 = vmatmul.mubr.msk.f32.vlgmr.msra.gmra.mrb[6].mxu0 %vm481_vm1, %v3277_v18  ;;  %2787 = vmatmul.mubr.msk.f32.vlgmr.msra.gmra.mrb[6].mxu1 %vm481_vm1, %v3277_v18 }
  0x36   : > { %2797 = vmatprep.mubr.msk.f32.mxu0 %vm3107_vm0, %v3108_v11  ;;  %2960 = vmatpush3.bf16.msra.mxu1 %v2959_v53  ;;  %v2579_v53 = vld [vmem:[%s3647_s6] ss:$0 sm:$0xff] }
  0x37   : > { %2808 = vmatprep.mubr.msk.f32.mxu1 %vm3107_vm0, %v3108_v11  ;;  %2961 = vmatprep.subr.bf16.mxu1 %v3106_v3 }
  0x38   : > { %2954 = vmatpush3.bf16.msra.mxu0 %v2953_v60 }
  0x39   : > { %2955 = vmatprep.subr.bf16.mxu0 %v3106_v3 }
  0x3a   : > { %2963 = vmatpush3.bf16.msra.mxu1 %v2962_v56 }
  0x3b   : > { %2970 = vmatprep.subr.bf16.mxu1 %v3106_v3 }
  0x3c   : > { %2957 = vmatpush3.bf16.msra.mxu0 %v2956_v2 }
  0x3d   : > { %2809 = vmatmul.mubr.msk.f32.vlgmr.msra.gmra.mrb[8].mxu1 %vm481_vm1, %v3277_v18  ;;  %2964 = vmatprep.subr.bf16.mxu0 %v3106_v3 }
  0x3e   : > { %2830 = vmatprep.mubr.msk.f32.mxu1 %vm3107_vm0, %v3108_v11  ;;  %2972 = vmatpush3.bf16.msra.mxu1 %v2971_v62 }
  0x3f   : > { %2973 = vmatprep.subr.bf16.mxu1 %v3106_v3  ;;  %2798 = vmatmul.mubr.msk.f32.vlgmr.msra.gmra.mrb[8].mxu0 %vm481_vm1, %v3277_v18 }
  0x40   : > { %2966 = vmatpush3.bf16.msra.mxu0 %v2965_v8  ;;  %2819 = vmatprep.mubr.msk.f32.mxu0 %vm3107_vm0, %v3108_v11 }
  0x41   : > { %2967 = vmatprep.subr.bf16.mxu0 %v3106_v3 }
  0x42   : > { %2975 = vmatpush3.bf16.msra.mxu1 %v2974_v5 }
  0x43   : > { %2833 = vmatprep.subr.mxu1 %v3108_v11 }
  0x44   : > { %2969 = vmatpush3.bf16.msra.mxu0 %v2968_v12 }
  0x45   : > { %2831 = vmatmul.mubr.msk.f32.vlgmr.msra.gmra.mrb[10].mxu1 %vm481_vm1, %v3277_v18  ;;  %2843 = vmatprep.subr.mxu0 %v3108_v11 }
  0x46   : > { %2835 = vmatprep.mubr.msk.f32.mxu1 %vm3107_vm0, %v3108_v11 }
  0x47   : > { %2820 = vmatmul.mubr.msk.f32.vlgmr.msra.gmra.mrb[10].mxu0 %vm481_vm1, %v3277_v18 }
  0x48   : > { %2845 = vmatprep.mubr.msk.f32.mxu0 %vm3107_vm0, %v3108_v11 }
  0xf0   : > { %v551_v13 = vpop.f32.mrb[0].mxu0  ;;  %v621_v15 = vpop.f32.mrb[0].mxu1 }
  0xf1   : > { %v2711_v14 = vpop.f32.mrb[1].mxu0  ;;  %v2722_v16 = vpop.f32.mrb[1].mxu1  ;;  %v552_v18 = vadd.f32 %v2563_v22, %v551_v13  ;;  %v622_v33 = vadd.f32 %v2564_v26, %v621_v15  ;;  %v2582_v26 = vld [vmem:[%s3647_s6 + $0x3] ss:$0 sm:$0xff] }
  0xf3   : > { %v1413_v32 = vmul.f32 0.35355338, %v552_v18  ;;  %v1414_v38 = vmul.f32 0.35355338, %v622_v33 }
  0xf8   : > { %v691_v17 = vpop.f32.mrb[2].mxu0  ;;  %v761_v20 = vpop.f32.mrb[2].mxu1 }
  0xf9   : > { %v2733_v19 = vpop.f32.mrb[3].mxu0  ;;  %v2744_v21 = vpop.f32.mrb[3].mxu1  ;;  %v692_v39 = vadd.f32 %v2565_v34, %v691_v17  ;;  %v762_v41 = vadd.f32 %v2566_v35, %v761_v20  ;;  %v2058_v35 = vld [vmem:[%s3648_s7] sm:$0xff] }
  0xfa   : > { %v2581_v21 = vld [vmem:[%s3647_s6 + $0x2] ss:$0 sm:$0xff] }
  0xfb   : > { %v1415_v47 = vmul.f32 0.35355338, %v692_v39  ;;  %v1416_v48 = vmul.f32 0.35355338, %v762_v41 }
 0x100   : > { %v875_v24 = vpop.f32.mrb[4].mxu0  ;;  %v945_v29 = vpop.f32.mrb[4].mxu1 }
 0x101   : > { %v876_v27 = vadd.f32 %v2571_v23, %v875_v24  ;;  %v2755_v28 = vpop.f32.mrb[5].mxu0  ;;  %v2766_v30 = vpop.f32.mrb[5].mxu1  ;;  %v946_v31 = vadd.f32 %v2572_v25, %v945_v29 }
 0x103   : > { %2834 = vmatpush3.xpose.msk.msra.mxu1 %vm1417_vm2, %v876_v27 }
 0x104   : > { %2838 = vmatprep.subr.mxu1 %v3108_v11 }
 0x106   : > { %2836 = vmatmul.mubr.msk.f32.vlgmr.msra.gmra.mrb[12].mxu1 %vm1417_vm2, %v1413_v32 }
 0x107   : > { %2839 = vmatpush3.xpose.msk.msra.mxu1 %vm1417_vm2, %v946_v31  ;;  %2840 = vmatprep.mubr.msk.f32.mxu1 %vm3107_vm0, %v3108_v11 }
 0x108   : > { %v1015_v40 = vpop.f32.mrb[6].mxu0  ;;  %2848 = vmatprep.subr.mxu1 %v3108_v11  ;;  %v1085_v43 = vpop.f32.mrb[6].mxu1 }
 0x109   : > { %v1016_v42 = vadd.f32 %v2573_v36, %v1015_v40  ;;  %v2777_v44 = vpop.f32.mrb[7].mxu0  ;;  %v1086_v45 = vadd.f32 %v2574_v37, %v1085_v43  ;;  %v2788_v46 = vpop.f32.mrb[7].mxu1  ;;  %v2059_v36 = vld [vmem:[%s3648_s7 + $0x8] sm:$0xff] }
 0x10a   : > { %2841 = vmatmul.mubr.msk.f32.vlgmr.msra.gmra.mrb[14].mxu1 %vm1417_vm2, %v1414_v38 }
 0x10b   : > { %2844 = vmatpush3.xpose.msk.msra.mxu0 %vm1417_vm2, %v1016_v42  ;;  %2850 = vmatprep.mubr.msk.f32.mxu1 %vm3107_vm0, %v3108_v11 }
 0x10c   : > { %2849 = vmatpush3.xpose.msk.msra.mxu1 %vm1417_vm2, %v1086_v45  ;;  %2853 = vmatprep.subr.mxu0 %v3108_v11  ;;  %v2060_v45 = vld [vmem:[%s3648_s7 + $0x10] sm:$0xff] }
 0x10d   : > { %2858 = vmatprep.subr.mxu1 %v3108_v11 }
 0x10e   : > { %2846 = vmatmul.mubr.msk.f32.vlgmr.msra.gmra.mrb[12].mxu0 %vm1417_vm2, %v1415_v47 }
 0x10f   : > { %2851 = vmatmul.mubr.msk.f32.vlgmr.msra.gmra.mrb[16].mxu1 %vm1417_vm2, %v1416_v48  ;;  %2855 = vmatprep.mubr.msk.f32.mxu0 %vm3107_vm0, %v3108_v11 }
 0x110   : > { %2860 = vmatprep.mubr.msk.f32.mxu1 %vm3107_vm0, %v3108_v11  ;;  %v1269_v50 = vpop.f32.mrb[8].mxu1 }
 0x111   : > { %v1270_v51 = vadd.f32 %v2580_v49, %v1269_v50  ;;  %v2810_v52 = vpop.f32.mrb[9].mxu1  ;;  %v2061_v50 = vld [vmem:[%s3648_s7 + $0x18] sm:$0xff] }
 0x112   : > { %v1199_v54 = vpop.f32.mrb[8].mxu0 }
 0x113   : > { %2859 = vmatpush3.msra.mxu1 %v1270_v51  ;;  %v1200_v55 = vadd.f32 %v2579_v53, %v1199_v54  ;;  %v2799_v56 = vpop.f32.mrb[9].mxu0 }
 0x114   : > { %2868 = vmatprep.subr.mxu1 %v3108_v11 }
 0x115   : > { %2854 = vmatpush3.msra.mxu0 %v1200_v55 }
 0x116   : > { %2863 = vmatprep.subr.mxu0 %v3108_v11 }
 0x118   : > { %v1409_v57 = vpop.f32.mrb[10].mxu1 }
 0x119   : > { %v2832_v58 = vpop.f32.mrb[11].mxu1  ;;  %v1410_v29 = vadd.f32 %v2582_v26, %v1409_v57 }
 0x11a   : > { %v1339_v59 = vpop.f32.mrb[10].mxu0 }
 0x11b   : > { %v2821_v60 = vpop.f32.mrb[11].mxu0  ;;  %v1340_v24 = vadd.f32 %v2581_v21, %v1339_v59  ;;  %v2400_v21 = vld [vmem:[%s3652_s11 + $0x8] sm:$0xff] }
 0x1d9   : > { %v1490_v61 = vpop.f32.mrb[12].mxu1 }
 0x1da   : > { %v2837_v62 = vpop.f32.mrb[13].mxu1  ;;  %v1722_v63 = vsel %vm1417_vm2, %v1490_v61, -inf }
 0x1db   : > { %1723 = vmax.xlane.f32.xlu0 %v1722_v63 }
 0x1dd   : > { %v1566_v0 = vpop.f32.mrb[14].mxu1 }
 0x1de   : > { %v2842_v1 = vpop.f32.mrb[15].mxu1  ;;  %v1725_v2 = vsel %vm1417_vm2, %v1566_v0, -inf }
 0x1df   : > { %1726 = vmax.xlane.f32.xlu0 %v1725_v2 }
 0x1e1   : > { %v1642_v4 = vpop.f32.mrb[12].mxu0 }
 0x1e2   : > { %v1718_v5 = vpop.f32.mrb[16].mxu1  ;;  %v2847_v6 = vpop.f32.mrb[13].mxu0  ;;  %v1728_v7 = vsel %vm1417_vm2, %v1642_v4, -inf }
 0x1e3   : > { %v2852_v8 = vpop.f32.mrb[17].mxu1  ;;  %1729 = vmax.xlane.f32.xlu1 %v1728_v7  ;;  %v1731_v9 = vsel %vm1417_vm2, %v1718_v5, -inf }
 0x1e7   : > { %1732 = vmax.xlane.f32.xlu1 %v1731_v9  ;;  %v2603_v9 = vld [vmem:[%s3649_s8] ss:$0 sm:$0xff] }
 0x268   : > { %v1724_v10 = vpop.xlane.xlu0 %1723 }
 0x269   : > { %v1734_v12 = vsub.f32 %v1490_v61, %v1724_v10 }
 0x26b   : > { %v1738_v13 = vmul.f32 1.442695, %v1734_v12 }
 0x26c   : > { %v1727_v14 = vpop.xlane.xlu0 %1726 }
 0x26d   : > { %3024 = vpow2.f32 %v1738_v13  ;;  %v1735_v15 = vsub.f32 %v1566_v0, %v1727_v14 }
 0x26f   : > { %v1740_v16 = vmul.f32 1.442695, %v1735_v15 }
 0x270   : > { %v1730_v17 = vpop.xlane.xlu1 %1729 }
 0x271   : > { %3026 = vpow2.f32 %v1740_v16  ;;  %v1736_v19 = vsub.f32 %v1642_v4, %v1730_v17 }
 0x273   : > { %v1742_v20 = vmul.f32 1.442695, %v1736_v19 }
 0x274   : > { %v1733_v22 = vpop.xlane.xlu1 %1732 }
 0x275   : > { %3028 = vpow2.f32 %v1742_v20  ;;  %v1737_v23 = vsub.f32 %v1718_v5, %v1733_v22  ;;  %v2399_v20 = vld [vmem:[%s3652_s11] sm:$0xff] }
 0x276   : > { %v2977_v22 = vpack.c.bf16 %v2400_v21, %v2399_v20 }
 0x277   : > { %v3025_v18 = vpop.eup %3024  ;;  %v1744_v25 = vmul.f32 1.442695, %v1737_v23  ;;  %v2401_v23 = vld [vmem:[%s3652_s11 + $0x10] sm:$0xff] }
 0x278   : > { %2856 = vmatmul.mubr.msk.f32.vlgmr.msra.gmra.mrb[14].mxu0 %vm1417_vm2, %v3025_v18  ;;  %v1746_v27 = vsel %vm1417_vm2, %v3025_v18, 0.0  ;;  %v2402_v18 = vld [vmem:[%s3652_s11 + $0x18] sm:$0xff] }
 0x279   : > { %3030 = vpow2.f32 %v1744_v25  ;;  %2864 = vmatpush3.msra.mxu0 %v1340_v24  ;;  %1747 = vadd.xlane.f32.xlu0 %v1746_v27  ;;  %v2980_v24 = vpack.c.bf16 %v2402_v18, %v2401_v23 }
 0x27a   : > { %2865 = vmatprep.mubr.msk.f32.mxu0 %vm3107_vm0, %v3108_v11  ;;  %2873 = vmatprep.subr.mxu0 %v3108_v11 }
 0x27b   : > { %v3027_v28 = vpop.eup %3026 }
 0x27c   : > { %2861 = vmatmul.mubr.msk.f32.vlgmr.msra.gmra.mrb[18].mxu1 %vm1417_vm2, %v3027_v28  ;;  %v1749_v30 = vsel %vm1417_vm2, %v3027_v28, 0.0 }
 0x27d   : > { %2869 = vmatpush3.msra.mxu1 %v1410_v29  ;;  %1750 = vadd.xlane.f32.xlu1 %v1749_v30  ;;  %v2605_v30 = vld [vmem:[%s3651_s10] ss:$0 sm:$0xff] }
 0x27e   : > { %2870 = vmatprep.mubr.msk.f32.mxu1 %vm3107_vm0, %v3108_v11  ;;  %2878 = vmatprep.subr.mxu1 %v3108_v11 }
 0x27f   : > { %v3029_v31 = vpop.eup %3028 }
 0x280   : > { %2866 = vmatmul.mubr.msk.f32.vlgmr.msra.gmra.mrb[16].mxu0 %vm1417_vm2, %v3029_v31  ;;  %v1752_v32 = vsel %vm1417_vm2, %v3029_v31, 0.0 }
 0x281   : > { %1753 = vadd.xlane.f32.xlu0 %v1752_v32  ;;  %2875 = vmatprep.mubr.msk.f32.mxu0 %vm3107_vm0, %v3108_v11 }
 0x282   : > { %2874 = vmatpush3.msra.mxu0 %v2058_v35 }
 0x283   : > { %v3031_v33 = vpop.eup %3030  ;;  %2883 = vmatprep.subr.mxu0 %v3108_v11 }
 0x284   : > { %2871 = vmatmul.mubr.msk.f32.vlgmr.msra.gmra.mrb[20].mxu1 %vm1417_vm2, %v3031_v33  ;;  %v1755_v34 = vsel %vm1417_vm2, %v3031_v33, 0.0  ;;  %v2606_v33 = vld [vmem:[%s3653_s12] ss:$0 sm:$0xff] }
 0x285   : > { %1756 = vadd.xlane.f32.xlu1 %v1755_v34  ;;  %2880 = vmatprep.mubr.msk.f32.mxu1 %vm3107_vm0, %v3108_v11 }
 0x286   : > { %2879 = vmatpush3.msra.mxu1 %v2059_v36 }
 0x287   : > { %2888 = vmatprep.subr.mxu1 %v3108_v11 }
 0x306   : > { %v1748_v37 = vpop.xlane.xlu0 %1747 }
 0x307   : > { %3032 = vrcp.f32 %v1748_v37 }
 0x30a   : > { %v1751_v38 = vpop.xlane.xlu1 %1750 }
 0x30b   : > { %3034 = vrcp.f32 %v1751_v38 }
 0x30e   : > { %v1754_v39 = vpop.xlane.xlu0 %1753 }
 0x30f   : > { %3036 = vrcp.f32 %v1754_v39 }
 0x311   : > { %v3033_v41 = vpop.eup %3032 }
 0x312   : > { %v1757_v40 = vpop.xlane.xlu1 %1756 }
 0x313   : > { %3038 = vrcp.f32 %v1757_v40 }
 0x315   : > { %v3035_v46 = vpop.eup %3034 }
 0x319   : > { %v3037_v51 = vpop.eup %3036 }
 0x31d   : > { %v3039_v55 = vpop.eup %3038 }
 0x34b   : > { %v1827_v42 = vpop.f32.mrb[14].mxu0 }
 0x34c   : > { %v2054_v43 = vmul.f32 %v3033_v41, %v1827_v42  ;;  %v2857_v44 = vpop.f32.mrb[15].mxu0 }
 0x34e   : > { %2876 = vmatmul.mubr.msk.f32.vlgmr.msra.gmra.mrb[18].mxu0 %vm1417_vm2, %v2054_v43 }
 0x34f   : > { %v1900_v47 = vpop.f32.mrb[18].mxu1  ;;  %2884 = vmatpush3.msra.mxu0 %v2060_v45  ;;  %2885 = vmatprep.mubr.msk.f32.mxu0 %vm3107_vm0, %v3108_v11 }
 0x350   : > { %v2055_v48 = vmul.f32 %v3035_v46, %v1900_v47  ;;  %v2862_v49 = vpop.f32.mrb[19].mxu1  ;;  %2976 = vmatprep.subr.bf16.mxu0 %v3106_v3 }
 0x352   : > { %2881 = vmatmul.mubr.msk.f32.vlgmr.msra.gmra.mrb[22].mxu1 %vm1417_vm2, %v2055_v48 }
 0x353   : > { %v1973_v52 = vpop.f32.mrb[16].mxu0  ;;  %2889 = vmatpush3.msra.mxu1 %v2061_v50  ;;  %2890 = vmatprep.mubr.msk.f32.mxu1 %vm3107_vm0, %v3108_v11 }
 0x354   : > { %v2056_v53 = vmul.f32 %v3037_v51, %v1973_v52  ;;  %v2867_v54 = vpop.f32.mrb[17].mxu0 }
 0x356   : > { %2886 = vmatmul.mubr.msk.f32.vlgmr.msra.gmra.mrb[20].mxu0 %vm1417_vm2, %v2056_v53 }
 0x357   : > { %v2046_v56 = vpop.f32.mrb[20].mxu1  ;;  %2901 = vmatprep.mubr.msk.f32.mxu0 %vm3107_vm0, %v3108_v11  ;;  %2978 = vmatpush3.bf16.msra.mxu0 %v2977_v22 }
 0x358   : > { %v2057_v57 = vmul.f32 %v3039_v55, %v2046_v56  ;;  %v2872_v58 = vpop.f32.mrb[21].mxu1  ;;  %2979 = vmatprep.subr.bf16.mxu0 %v3106_v3  ;;  %v2604_v3 = vld [vmem:[%s3650_s9] ss:$0 sm:$0xff] }
 0x35a   : > { %2891 = vmatmul.mubr.msk.f32.vlgmr.msra.gmra.mrb[24].mxu1 %vm1417_vm2, %v2057_v57 }
 0x35b   : > { %2981 = vmatpush3.bf16.msra.mxu0 %v2980_v24 }
 0x421   : > { %v2131_v59 = vpop.f32.mrb[18].mxu0 }
 0x422   : > { %v2877_v60 = vpop.f32.mrb[19].mxu0  ;;  %v2354_v62 = vsel %vm481_vm1, %v2131_v59, 0.0 }
 0x425   : > { %v2204_v61 = vpop.f32.mrb[22].mxu1 }
 0x426   : > { %v2355_v63 = vsel %vm481_vm1, %v2204_v61, 0.0  ;;  %v2882_v0 = vpop.f32.mrb[23].mxu1 }
 0x427   : > { %v2356_v1 = vadd.f32 %v2355_v63, %v2354_v62 }
 0x429   : > { %v2277_v2 = vpop.f32.mrb[20].mxu0 }
 0x42a   : > { %v2357_v4 = vsel %vm481_vm1, %v2277_v2, 0.0  ;;  %v2887_v5 = vpop.f32.mrb[21].mxu0 }
 0x42b   : > { %v2358_v6 = vadd.f32 %v2357_v4, %v2356_v1 }
 0x42d   : > { %v2350_v7 = vpop.f32.mrb[24].mxu1 }
 0x42e   : > { %v2359_v11 = vsel %vm481_vm1, %v2350_v7, 0.0  ;;  %v2892_v8 = vpop.f32.mrb[25].mxu1 }
 0x42f   : > { %v2360_v10 = vadd.f32 %v2359_v11, %v2358_v6 }
 0x431   : > { %v2368_v12 = vadd.f32 %v2603_v9, %v2360_v10 }
 0x433   : > { %v2369_v13 = vsel %vm481_vm1, %v2368_v12, 0.0 }
 0x434   : > { %2370 = vadd.xlane.f32.xlu0 %v2369_v13 }
 0x4c1   : > { %v2371_v14 = vpop.xlane.xlu0 %2370 }
 0x4c2   : > { %v2373_v15 = vmul.f32 0.03125, %v2371_v14 }
 0x4c4   : > { %v2374_v16 = vsub.f32 %v2368_v12, %v2373_v15 }
 0x4c6   : > { %v2375_v17 = vmul.f32 %v2374_v16, %v2374_v16 }
 0x4c8   : > { %v2376_v19 = vsel %vm481_vm1, %v2375_v17, 0.0 }
 0x4c9   : > { %2377 = vadd.xlane.f32.xlu1 %v2376_v19 }
 0x556   : > { %v2378_v25 = vpop.xlane.xlu1 %2377 }
 0x557   : > { %v2379_v26 = vmul.f32 0.03125, %v2378_v25 }
 0x559   : > { %v2380_v27 = vadd.f32 1e-05, %v2379_v26 }
 0x55b   : > { %3040 = vrsqrt.f32 %v2380_v27 }
 0x565   : > { %v3041_v28 = vpop.eup %3040 }
 0x566   : > { %v2382_v29 = vmul.f32 %v3041_v28, %v2374_v16 }
 0x568   : > { %v2390_v31 = vmul.f32 %v2604_v3, %v2382_v29 }
 0x56a   : > { %v2398_v32 = vadd.f32 %v2605_v30, %v2390_v31 }
 0x56c   : > { %2902 = vmatmul.mubr.msk.f32.vlgmr.msra.gmra.mrb[22].mxu0 %vm481_vm1, %v2398_v32 }
 0x63f   : > { %v2479_v34 = vpop.f32.mrb[22].mxu0 }
 0x640   : > { %v2480_v35 = vadd.f32 %v2606_v33, %v2479_v34  ;;  %v2903_v36 = vpop.f32.mrb[23].mxu0 }
 0x642   : > { %2483 = vst [vmem:[%s431_s17] sm:$0xff] %v2480_v35 }
 0x643   : > { %3055 = shalt.err (!%p3052_p3)
}
 0x644   : > { %s3056_s30 = scalar_lea.hbm %s3599_s22, 128  ;;  %s3060_s17 = scalar_lea.hbm %s3654_s13, 256 }
 0x645   : > { %p3057_p4 = scmp.ne.s32.totalorder %s3599_s22, %s3056_s30  ;;  %p3061_p9 = scmp.lt.u32.totalorder %s3599_s22, %s3654_s13 }
 0x646   : > { %p3062_p10 = scmp.lt.u32.totalorder %s3060_s17, %s3056_s30  ;;  %p3064_p12 = scmp.lt.u32.totalorder %s3056_s30, %s3599_s22 }
 0x647   : > { %p3058_p7 = pnand %p3057_p4, %p3218_p5 }
 0x648   : > { %p3063_p11 = por %p3062_p10, %p3061_p9 }
 0x649   : > { %p3059_p8 = pneg %p3058_p7 }
 0x64a   : > { %p3065_p13 = por %p3064_p12, %p3063_p11 }
 0x64c   : > { %p3066_p0 = pnand %p3065_p13, %p3059_p8 }
 0x64e   : > { %3069 = shalt.err (!%p3066_p0)
}
 0x64f   : > { %2982 = dma.vmem_to_hbm [thread:$0]  (%p3218_p5), %s3601_s14, 128, %s3599_s22, %s2485_s23  }
 0x650 PF: > { %p2988_p1 = scmp.ge.s32.totalorder %s3104_s28, 2  ;;  %s2510_s29 = sand.u32 1, %s3092_s25  }
 0x651   : > { %s2511_s16 = scalar_lea.sflag [#allocation3], %s2510_s29 }
 0x652   : > { %p2985_p2 = pnand %p2988_p1, %p3222_p6 }
 0x654   : > { %3087 = dma.done.wait (!%p2985_p2), %s2511_s16, 128  }
 0x655   : > { %3089 = vsyncadd (!%p2985_p2), %s2511_s16, 4294967168  ;;  %s3666_s28 = sld [smem:[#allocation6_spill]]  ;;  %s3667_s15 = sld [smem:[#allocation5_spill]] }
 0x656   : > { %s3668_s27 = sld [smem:[#allocation7_spill]]  ;;  %s3669_s25 = smov %s3096_s26 }
 0x65b   : > { %p23_p3 = scmp.ge.s32.totalorder %s3666_s28, 4   ;;  %s3670_s26 = smov %s3667_s15 }
 0x65d   :  { %25 = sbr.rel (!%p23_p3) target bundleno = 3 (0x3), region = 107 }
 0x664   :  { %2516 = vsyncpa [#allocation3], 1 }
 0x665   :  { %2518 = vsyncpa [#allocation3 + $0x1], 1 }

</bundles_post_ra>
